<compile_context>
chip_gen: v6e
topology: v6e:2x2x1
jax: 0.10.0
libtpu: 0.0.40
codegen_flags: <defaults>
</compile_context>

<pallas_src>
import functools

import jax
import jax.numpy as jnp
from jax.experimental import pallas as pl
from jax.experimental.pallas import tpu as pltpu

LANE = 128


def _round_up(x, m):
    return ((x + m - 1) // m) * m


def _vmem_capacity_bytes():
    """Physical per-core VMEM (128 MiB on v5e/v6e, 64 MiB on v7x)."""
    try:
        return int(pltpu.get_tpu_info().vmem_capacity_bytes)
    except Exception:
        return 64 * 2 ** 20  # conservative fallback: assume v7x-sized VMEM


def mlp_kernel(x_ref, w1_ref, b1_ref, w2_ref, b2_ref, w3_ref, b3_ref, o_ref,
               acc_ref, *, num_classes):
    """Grid = (batch tiles, fc1 K tiles).

    fc1 is accumulated into a f32 VMEM scratch over the K axis; bias+ReLU, fc2,
    fc3 and the log-softmax run once on the last K step.
    """
    k = pl.program_id(1)

    @pl.when(k == 0)
    def _init():
        acc_ref[...] = jnp.zeros_like(acc_ref)

    # x arrives as f32 and is cast to bf16 on-chip (saves an HBM pass in the
    # wrapper); MXU matmul in bf16 with f32 accumulation.
    x = x_ref[...].astype(jnp.bfloat16)
    acc_ref[...] += jnp.dot(x, w1_ref[...], preferred_element_type=jnp.float32)

    @pl.when(k == pl.num_programs(1) - 1)
    def _finish():
        h1 = jnp.maximum(acc_ref[...] + b1_ref[...], 0.0)                # ReLU
        h2 = jnp.dot(h1.astype(w2_ref.dtype), w2_ref[...],
                     preferred_element_type=jnp.float32)
        h2 = jnp.maximum(h2 + b2_ref[...], 0.0)                          # ReLU
        logits = jnp.dot(h2.astype(w3_ref.dtype), w3_ref[...],
                         preferred_element_type=jnp.float32) + b3_ref[...]

        # Class lanes are zero-padded to a 128 multiple; mask the pad lanes so
        # the log-softmax reductions only see the real classes.
        lane = jax.lax.broadcasted_iota(jnp.int32, logits.shape, 1)
        valid = lane < num_classes
        logits = jnp.where(valid, logits, jnp.float32(-1e30))
        m = jnp.max(logits, axis=-1, keepdims=True)
        shifted = logits - m
        e = jnp.where(valid, jnp.exp(shifted), 0.0)
        lse = jnp.log(jnp.sum(e, axis=-1, keepdims=True))
        o_ref[...] = (shifted - lse).astype(o_ref.dtype)                 # LogSoftmax


@functools.partial(jax.jit, static_argnames=("image_size",))
def mlp_forward(x_nchw, params, *, image_size):
    """x_nchw: (B, 3, image_size, image_size) float32. Returns (B, num_classes) f32."""
    w1, b1, w2, b2, w3, b3 = params          # weights stored as (in, out)
    B = x_nchw.shape[0]
    d_in = image_size * image_size * 3
    hidden = w1.shape[1]
    num_classes = w3.shape[1]

    h_p = _round_up(hidden, LANE)
    c_p = _round_up(num_classes, LANE)
    d_in_128 = _round_up(d_in, LANE)

    vmem_cap = _vmem_capacity_bytes()
    vmem_budget = int(vmem_cap * 0.80)       # leave headroom for Mosaic internals

    # --- fc1 weight: fully resident (single buffer) when it fits, else K-tiled ---
    small_resident = (h_p * h_p + h_p * c_p) * 2 + (2 * h_p + c_p) * 4   # w2,w3,biases
    w1_bytes = d_in_128 * h_p * 2
    if small_resident + w1_bytes <= (2 * vmem_budget) // 3:
        nk, tk = 1, d_in_128
        w1_buffers = 1                       # constant block index -> single buffer
    else:
        # Stream fc1's K dimension; give its double-buffered block ~1/4 of VMEM.
        tk = max(LANE, min(d_in_128,
                           ((vmem_budget // 4) // (2 * h_p * 2)) // LANE * LANE))
        nk = pl.cdiv(d_in_128, tk)
        w1_buffers = 2
    d_in_p = nk * tk

    fixed_bytes = small_resident + w1_buffers * tk * h_p * 2
    # Per-batch-row streaming VMEM: 2x f32 x buffers, 2x f32 out buffers, the
    # f32 fc1 accumulator, plus an allowance for h1/h2/logits temporaries.
    per_row = 2 * tk * 4 + 2 * c_p * 4 + h_p * 4 + (2 * h_p + 2 * c_p) * 4
    tb_max = (vmem_budget - fixed_bytes) // per_row
    if tb_max < 16:
        # TODO(synk): also K-tile fc2/fc3 (and the hidden dim) for huge hidden sizes.
        raise NotImplementedError("MLP layer sizes exceed the per-core VMEM budget")

    # Batch tile: as large as the budget allows (<=1024), 16-aligned (bf16 packs
    # 16 rows per sublane-vreg). For moderate batches keep >=2 grid steps so the
    # "parallel" axis can split across v7x's two TensorCores.
    tb = min(int(tb_max) // 16 * 16, 1024, _round_up(B, 16))
    if B > 64:
        tb = min(tb, _round_up(pl.cdiv(B, 2), 16))
    tb = max(16, tb)
    b_p = _round_up(B, tb)
    nb = b_p // tb

    # ---- layout prep in plain JAX (torch .view flattening order) ----
    x = x_nchw.reshape(B, d_in).astype(jnp.float32)
    if b_p != B or d_in_p != d_in:
        x = jnp.pad(x, ((0, b_p - B), (0, d_in_p - d_in)))

    w1p = jnp.pad(w1, ((0, d_in_p - d_in), (0, h_p - hidden))).astype(jnp.bfloat16)
    w2p = jnp.pad(w2, ((0, h_p - hidden), (0, h_p - hidden))).astype(jnp.bfloat16)
    w3p = jnp.pad(w3, ((0, h_p - hidden), (0, c_p - num_classes))).astype(jnp.bfloat16)
    b1p = jnp.pad(b1, (0, h_p - hidden)).reshape(1, h_p).astype(jnp.float32)
    b2p = jnp.pad(b2, (0, h_p - hidden)).reshape(1, h_p).astype(jnp.float32)
    b3p = jnp.pad(b3, (0, c_p - num_classes)).reshape(1, c_p).astype(jnp.float32)

    def resident(shape):
        # Constant-index blocks: fetched once and kept in a single VMEM buffer.
        return pl.BlockSpec(shape, lambda i, k: (0,) * len(shape),
                            pipeline_mode=pl.Buffered(1))

    w1_spec = (resident((tk, h_p)) if nk == 1
               else pl.BlockSpec((tk, h_p), lambda i, k: (k, 0)))

    vmem_need = fixed_bytes + tb * per_row
    vmem_limit = int(min(0.85 * vmem_cap, max(1.4 * vmem_need, 16 * 2 ** 20)))

    flops = 2 * b_p * (d_in_p * h_p + h_p * h_p + h_p * c_p)
    bytes_accessed = (b_p * d_in_p * 4
                      + (w1p.size + w2p.size + w3p.size) * 2
                      + (b1p.size + b2p.size + b3p.size) * 4
                      + b_p * c_p * 4)

    out = pl.pallas_call(
        functools.partial(mlp_kernel, num_classes=num_classes),
        out_shape=jax.ShapeDtypeStruct((b_p, c_p), jnp.float32),
        grid_spec=pltpu.PrefetchScalarGridSpec(
            num_scalar_prefetch=0,
            grid=(nb, nk),
            in_specs=[
                pl.BlockSpec((tb, tk), lambda i, k: (i, k)),   # streamed f32 x
                w1_spec,
                resident((1, h_p)),
                resident((h_p, h_p)),
                resident((1, h_p)),
                resident((h_p, c_p)),
                resident((1, c_p)),
            ],
            out_specs=pl.BlockSpec((tb, c_p), lambda i, k: (i, 0)),
            scratch_shapes=[pltpu.VMEM((tb, h_p), jnp.float32)],
        ),
        compiler_params=pltpu.CompilerParams(
            dimension_semantics=("parallel", "arbitrary"),
            vmem_limit_bytes=vmem_limit,
        ),
        cost_estimate=pl.CostEstimate(
            flops=flops,
            transcendentals=b_p * (c_p + 1),
            bytes_accessed=bytes_accessed,
        ),
    )(x, w1p, b1p, w2p, b2p, w3p, b3p)

    return out[:B, :num_classes]


def init_params(key, image_size, hidden_size, num_classes):
    """nn.Linear-style init (U[-1/sqrt(fan_in), 1/sqrt(fan_in)]); weights (in, out)."""
    d_in = image_size * image_size * 3
    ks = jax.random.split(key, 6)

    def linear(kw, kb, fan_in, fan_out):
        bound = 1.0 / jnp.sqrt(fan_in)
        w = jax.random.uniform(kw, (fan_in, fan_out), jnp.float32, -bound, bound)
        b = jax.random.uniform(kb, (fan_out,), jnp.float32, -bound, bound)
        return w, b

    w1, b1 = linear(ks[0], ks[1], d_in, hidden_size)
    w2, b2 = linear(ks[2], ks[3], hidden_size, hidden_size)
    w3, b3 = linear(ks[4], ks[5], hidden_size, num_classes)
    return (w1, b1, w2, b2, w3, b3)


def reference_bf16(x_nchw, params):
    """Plain-JAX reference mirroring the kernel's bf16-matmul / f32-accum numerics."""
    w1, b1, w2, b2, w3, b3 = params
    x = x_nchw.reshape(x_nchw.shape[0], -1).astype(jnp.bfloat16)
    h = jnp.dot(x, w1.astype(jnp.bfloat16), preferred_element_type=jnp.float32) + b1
    h = jnp.maximum(h, 0.0)
    h = jnp.dot(h.astype(jnp.bfloat16), w2.astype(jnp.bfloat16),
                preferred_element_type=jnp.float32) + b2
    h = jnp.maximum(h, 0.0)
    logits = jnp.dot(h.astype(jnp.bfloat16), w3.astype(jnp.bfloat16),
                     preferred_element_type=jnp.float32) + b3
    return jax.nn.log_softmax(logits, axis=-1)


if __name__ == "__main__":
    image_size = 16
    hidden_size = 32
    num_classes = 10
    batch = 2

    key = jax.random.PRNGKey(0)
    k_x, k_p = jax.random.split(key)
    x = jax.random.normal(k_x, (batch, 3, image_size, image_size), jnp.float32)
    params = init_params(k_p, image_size, hidden_size, num_classes)

    out = mlp_forward(x, params, image_size=image_size)
    jax.block_until_ready(out)

    ref = reference_bf16(x, params)
    assert out.shape == (batch, num_classes)
    assert jnp.allclose(out, ref, atol=2e-3, rtol=2e-3), "mismatch vs reference"

    print("KERNEL_OK")
</pallas_src>

<mosaic_0001>
module attributes {stable_mosaic.version = 11 : i64} {
  func.func @mlp_kernel(%arg0: i32, %arg1: i32, %arg2: memref<16x768xf32, #tpu.memory_space<vmem>>, %arg3: memref<768x128xbf16, #tpu.memory_space<vmem>>, %arg4: memref<1x128xf32, #tpu.memory_space<vmem>>, %arg5: memref<128x128xbf16, #tpu.memory_space<vmem>>, %arg6: memref<1x128xf32, #tpu.memory_space<vmem>>, %arg7: memref<128x128xbf16, #tpu.memory_space<vmem>>, %arg8: memref<1x128xf32, #tpu.memory_space<vmem>>, %arg9: memref<16x128xf32, #tpu.memory_space<vmem>>, %arg10: memref<16x128xf32, #tpu.memory_space<vmem>>) attributes {dimension_semantics = [#tpu.dimension_semantics<parallel>, #tpu.dimension_semantics<arbitrary>], iteration_bounds = array<i64: 1, 1>, scalar_prefetch = 0 : i64, scratch_operands = 1 : i64, tpu.core_type = #tpu.core_type<tc>, window_params = [{transform_indices = @transform_0, window_bounds = array<i64: 16, 768>}, {pipeline_mode = #tpu.pipeline_mode<synchronous>, transform_indices = @transform_1, window_bounds = array<i64: 768, 128>}, {pipeline_mode = #tpu.pipeline_mode<synchronous>, transform_indices = @transform_2, window_bounds = array<i64: 1, 128>}, {pipeline_mode = #tpu.pipeline_mode<synchronous>, transform_indices = @transform_3, window_bounds = array<i64: 128, 128>}, {pipeline_mode = #tpu.pipeline_mode<synchronous>, transform_indices = @transform_4, window_bounds = array<i64: 1, 128>}, {pipeline_mode = #tpu.pipeline_mode<synchronous>, transform_indices = @transform_5, window_bounds = array<i64: 128, 128>}, {pipeline_mode = #tpu.pipeline_mode<synchronous>, transform_indices = @transform_6, window_bounds = array<i64: 1, 128>}, {transform_indices = @transform_7, window_bounds = array<i64: 16, 128>}]} {
    %c0_i32 = arith.constant 0 : i32
    %0 = arith.cmpi eq, %arg1, %c0_i32 : i32
    %1 = arith.extui %0 : i1 to i32
    %c0_i32_0 = arith.constant 0 : i32
    %2 = arith.cmpi ne, %1, %c0_i32_0 : i32
    scf.if %2 {
      %cst_10 = arith.constant 0.000000e+00 : f32
      %13 = vector.broadcast %cst_10 : f32 to vector<16x128xf32>
      %c0_11 = arith.constant 0 : index
      %c0_12 = arith.constant 0 : index
      %14 = vector.load %arg10[%c0_11, %c0_12] : memref<16x128xf32, #tpu.memory_space<vmem>>, vector<16x128xf32>
      tpu.vector_store %arg10[%c0_11, %c0_12], %13 {strides = array<i32>} : memref<16x128xf32, #tpu.memory_space<vmem>>, vector<16x128xf32>,
    } else {
    }
    %c0 = arith.constant 0 : index
    %c0_1 = arith.constant 0 : index
    %3 = vector.load %arg2[%c0, %c0_1] : memref<16x768xf32, #tpu.memory_space<vmem>>, vector<16x768xf32>
    %4 = arith.truncf %3 : vector<16x768xf32> to vector<16x768xbf16>
    %c0_2 = arith.constant 0 : index
    %c0_3 = arith.constant 0 : index
    %5 = vector.load %arg10[%c0_2, %c0_3] : memref<16x128xf32, #tpu.memory_space<vmem>>, vector<16x128xf32>
    %c0_4 = arith.constant 0 : index
    %c0_5 = arith.constant 0 : index
    %6 = vector.load %arg3[%c0_4, %c0_5] : memref<768x128xbf16, #tpu.memory_space<vmem>>, vector<768x128xbf16>
    %cst = arith.constant dense<0.000000e+00> : vector<16x128xf32>
    %7 = tpu.matmul %4, %6, %cst {dimension_numbers = #tpu.dot_dimension_numbers<[1], [0], [0], [1], [0, 0, 1, 1], [], []>} : vector<16x768xbf16>, vector<768x128xbf16>, vector<16x128xf32> -> vector<16x128xf32>
    %8 = arith.addf %5, %7 : vector<16x128xf32>
    %c0_6 = arith.constant 0 : index
    %c0_7 = arith.constant 0 : index
    %9 = vector.load %arg10[%c0_6, %c0_7] : memref<16x128xf32, #tpu.memory_space<vmem>>, vector<16x128xf32>
    tpu.vector_store %arg10[%c0_6, %c0_7], %8 {strides = array<i32>} : memref<16x128xf32, #tpu.memory_space<vmem>>, vector<16x128xf32>,
    %c0_i32_8 = arith.constant 0 : i32
    %10 = arith.cmpi eq, %arg1, %c0_i32_8 : i32
    %11 = arith.extui %10 : i1 to i32
    %c0_i32_9 = arith.constant 0 : i32
    %12 = arith.cmpi ne, %11, %c0_i32_9 : i32
    scf.if %12 {
      %c0_10 = arith.constant 0 : index
      %c0_11 = arith.constant 0 : index
      %13 = vector.load %arg10[%c0_10, %c0_11] : memref<16x128xf32, #tpu.memory_space<vmem>>, vector<16x128xf32>
      %c0_12 = arith.constant 0 : index
      %c0_13 = arith.constant 0 : index
      %14 = vector.load %arg4[%c0_12, %c0_13] : memref<1x128xf32, #tpu.memory_space<vmem>>, vector<1x128xf32>
      %15 = vector.broadcast %14 : vector<1x128xf32> to vector<16x128xf32>
      %16 = arith.addf %13, %15 : vector<16x128xf32>
      %cst_14 = arith.constant 0.000000e+00 : f32
      %17 = vector.broadcast %cst_14 : f32 to vector<16x128xf32>
      %18 = arith.maximumf %16, %17 : vector<16x128xf32>
      %19 = arith.truncf %18 : vector<16x128xf32> to vector<16x128xbf16>
      %c0_15 = arith.constant 0 : index
      %c0_16 = arith.constant 0 : index
      %20 = vector.load %arg5[%c0_15, %c0_16] : memref<128x128xbf16, #tpu.memory_space<vmem>>, vector<128x128xbf16>
      %cst_17 = arith.constant dense<0.000000e+00> : vector<16x128xf32>
      %21 = tpu.matmul %19, %20, %cst_17 {dimension_numbers = #tpu.dot_dimension_numbers<[1], [0], [0], [1], [0, 0, 1, 1], [], []>} : vector<16x128xbf16>, vector<128x128xbf16>, vector<16x128xf32> -> vector<16x128xf32>
      %c0_18 = arith.constant 0 : index
      %c0_19 = arith.constant 0 : index
      %22 = vector.load %arg6[%c0_18, %c0_19] : memref<1x128xf32, #tpu.memory_space<vmem>>, vector<1x128xf32>
      %23 = vector.broadcast %22 : vector<1x128xf32> to vector<16x128xf32>
      %24 = arith.addf %21, %23 : vector<16x128xf32>
      %cst_20 = arith.constant 0.000000e+00 : f32
      %25 = vector.broadcast %cst_20 : f32 to vector<16x128xf32>
      %26 = arith.maximumf %24, %25 : vector<16x128xf32>
      %27 = arith.truncf %26 : vector<16x128xf32> to vector<16x128xbf16>
      %c0_21 = arith.constant 0 : index
      %c0_22 = arith.constant 0 : index
      %28 = vector.load %arg7[%c0_21, %c0_22] : memref<128x128xbf16, #tpu.memory_space<vmem>>, vector<128x128xbf16>
      %cst_23 = arith.constant dense<0.000000e+00> : vector<16x128xf32>
      %29 = tpu.matmul %27, %28, %cst_23 {dimension_numbers = #tpu.dot_dimension_numbers<[1], [0], [0], [1], [0, 0, 1, 1], [], []>} : vector<16x128xbf16>, vector<128x128xbf16>, vector<16x128xf32> -> vector<16x128xf32>
      %c0_24 = arith.constant 0 : index
      %c0_25 = arith.constant 0 : index
      %30 = vector.load %arg8[%c0_24, %c0_25] : memref<1x128xf32, #tpu.memory_space<vmem>>, vector<1x128xf32>
      %31 = vector.broadcast %30 : vector<1x128xf32> to vector<16x128xf32>
      %32 = arith.addf %29, %31 : vector<16x128xf32>
      %33 = tpu.iota {dimensions = array<i32: 1>} : vector<16x128xi32>
      %c10_i32 = arith.constant 10 : i32
      %34 = vector.broadcast %c10_i32 : i32 to vector<16x128xi32>
      %35 = arith.cmpi slt, %33, %34 : vector<16x128xi32>
      %cst_26 = arith.constant -1.000000e+30 : f32
      %36 = vector.broadcast %cst_26 : f32 to vector<16x128xf32>
      %37 = arith.select %35, %32, %36 : vector<16x128xi1>, vector<16x128xf32>
      %cst_27 = arith.constant dense<0xFF800000> : vector<16xf32>
      %38 = vector.multi_reduction <maximumf>, %37, %cst_27 [1] : vector<16x128xf32> to vector<16xf32>
      %39 = vector.shape_cast %38 : vector<16xf32> to vector<16x1xf32>
      %40 = vector.broadcast %39 : vector<16x1xf32> to vector<16x128xf32>
      %41 = arith.subf %37, %40 : vector<16x128xf32>
      %42 = math.exp %41 : vector<16x128xf32>
      %cst_28 = arith.constant 0.000000e+00 : f32
      %43 = vector.broadcast %cst_28 : f32 to vector<16x128xf32>
      %44 = arith.select %35, %42, %43 : vector<16x128xi1>, vector<16x128xf32>
      %cst_29 = arith.constant dense<0.000000e+00> : vector<16xf32>
      %45 = vector.multi_reduction <add>, %44, %cst_29 [1] : vector<16x128xf32> to vector<16xf32>
      %46 = vector.shape_cast %45 : vector<16xf32> to vector<16x1xf32>
      %47 = math.log %46 : vector<16x1xf32>
      %48 = vector.broadcast %47 : vector<16x1xf32> to vector<16x128xf32>
      %49 = arith.subf %41, %48 : vector<16x128xf32>
      %c0_30 = arith.constant 0 : index
      %c0_31 = arith.constant 0 : index
      %50 = vector.load %arg9[%c0_30, %c0_31] : memref<16x128xf32, #tpu.memory_space<vmem>>, vector<16x128xf32>
      tpu.vector_store %arg9[%c0_30, %c0_31], %49 {strides = array<i32>} : memref<16x128xf32, #tpu.memory_space<vmem>>, vector<16x128xf32>,
    } else {
    }
    return
  }
  func.func @transform_0(%arg0: i32, %arg1: i32) -> (i32, i32) {
    %c0_i32 = arith.constant 0 : i32
    return %arg0, %arg1 : i32, i32
  }
  func.func @transform_1(%arg0: i32, %arg1: i32) -> (i32, i32) {
    %c0_i32 = arith.constant 0 : i32
    %c0_i32_0 = arith.constant 0 : i32
    %c0_i32_1 = arith.constant 0 : i32
    return %c0_i32, %c0_i32_0 : i32, i32
  }
  func.func @transform_2(%arg0: i32, %arg1: i32) -> (i32, i32) {
    %c0_i32 = arith.constant 0 : i32
    %c0_i32_0 = arith.constant 0 : i32
    %c0_i32_1 = arith.constant 0 : i32
    return %c0_i32, %c0_i32_0 : i32, i32
  }
  func.func @transform_3(%arg0: i32, %arg1: i32) -> (i32, i32) {
    %c0_i32 = arith.constant 0 : i32
    %c0_i32_0 = arith.constant 0 : i32
    %c0_i32_1 = arith.constant 0 : i32
    return %c0_i32, %c0_i32_0 : i32, i32
  }
  func.func @transform_4(%arg0: i32, %arg1: i32) -> (i32, i32) {
    %c0_i32 = arith.constant 0 : i32
    %c0_i32_0 = arith.constant 0 : i32
    %c0_i32_1 = arith.constant 0 : i32
    return %c0_i32, %c0_i32_0 : i32, i32
  }
  func.func @transform_5(%arg0: i32, %arg1: i32) -> (i32, i32) {
    %c0_i32 = arith.constant 0 : i32
    %c0_i32_0 = arith.constant 0 : i32
    %c0_i32_1 = arith.constant 0 : i32
    return %c0_i32, %c0_i32_0 : i32, i32
  }
  func.func @transform_6(%arg0: i32, %arg1: i32) -> (i32, i32) {
    %c0_i32 = arith.constant 0 : i32
    %c0_i32_0 = arith.constant 0 : i32
    %c0_i32_1 = arith.constant 0 : i32
    return %c0_i32, %c0_i32_0 : i32, i32
  }
  func.func @transform_7(%arg0: i32, %arg1: i32) -> (i32, i32) {
    %c0_i32 = arith.constant 0 : i32
    %c0_i32_0 = arith.constant 0 : i32
    return %arg0, %c0_i32 : i32, i32
  }
}

</mosaic_0001>

<bundles_post_ra>
// kernel: mlp_forward.1
= control target key start
LH: loop header
LB: loop body
LE: loop exit
PB: predicated region body
PF: predicated region fallthrough
CT: control target
= control target key end

     0   :  { %vm1107_vm0 = vmmov 0   ;;  %s1413_s1 = inlined_call_operand.vmem [shape: bf16[768,128], index: 1, kind: input, shape index: {}]   ;;  %s1414_s0 = inlined_call_operand.vmem [shape: f32[16,768], index: 0, kind: input, shape index: {}]   ;;  %s1415_s3 = inlined_call_operand.vmem [shape: bf16[128,128], index: 3, kind: input, shape index: {}]   ;;  %s1416_s5 = inlined_call_operand.vmem [shape: bf16[128,128], index: 5, kind: input, shape index: {}]   ;;  %s1417_s2 = inlined_call_operand.vmem [shape: f32[1,128], index: 2, kind: input, shape index: {}]   ;;  %s1418_s4 = inlined_call_operand.vmem [shape: f32[1,128], index: 4, kind: input, shape index: {}]   ;;  %s1419_s6 = inlined_call_operand.vmem [shape: f32[1,128], index: 6, kind: input, shape index: {}]   ;;  %s1420_s7 = inlined_call_operand.vmem [shape: f32[16,128], index: 7, kind: output, shape index: {}]  }
   0x1   :  { %v1034_v0 = vld [vmem:[%s1413_s1 + $0x78] sm:$0xff]   ;;  %v1038_v4 = vld [vmem:[%s1413_s1 + $0x70] sm:$0xff]   ;;  %v1042_v8 = vld [vmem:[%s1413_s1 + $0x68] sm:$0xff]  }
   0x2   :  { %v1035_v1 = vld [vmem:[%s1413_s1 + $0xf8] sm:$0xff]   ;;  %908 = vmatprep.subr.bf16.mxu0 %v1034_v0  ;;  %v1039_v5 = vld [vmem:[%s1413_s1 + $0xf0] sm:$0xff]   ;;  %v1043_v9 = vld [vmem:[%s1413_s1 + $0xe8] sm:$0xff]  }
   0x3   :  { %v1036_v2 = vld [vmem:[%s1413_s1 + $0x38] sm:$0xff]   ;;  %930 = vmatprep.subr.bf16.mxu1 %v1035_v1  ;;  %v1040_v6 = vld [vmem:[%s1413_s1 + $0x30] sm:$0xff]   ;;  %v1044_v10 = vld [vmem:[%s1413_s1 + $0x28] sm:$0xff]  }
   0x4   :  { %v1037_v3 = vld [vmem:[%s1413_s1 + $0xb8] sm:$0xff]   ;;  %909 = vmatpush3.bf16.msra.mxu0 %v1036_v2  ;;  %v1041_v7 = vld [vmem:[%s1413_s1 + $0xb0] sm:$0xff]   ;;  %v1045_v11 = vld [vmem:[%s1413_s1 + $0xa8] sm:$0xff]   ;;  %v1106_v2 = vmov 0.0  }
   0x5   :  { %931 = vmatpush3.bf16.msra.mxu1 %v1037_v3  ;;  %910 = vmatprep.subr.bf16.mxu0 %v1038_v4  ;;  %v1046_v12 = vld [vmem:[%s1413_s1 + $0x60] sm:$0xff]   ;;  %v1050_v16 = vld [vmem:[%s1413_s1 + $0x58] sm:$0xff]   ;;  %v1054_v20 = vld [vmem:[%s1413_s1 + $0x50] sm:$0xff]  }
   0x6   :  { %932 = vmatprep.subr.bf16.mxu1 %v1039_v5  ;;  %v1047_v13 = vld [vmem:[%s1413_s1 + $0xe0] sm:$0xff]   ;;  %v1051_v17 = vld [vmem:[%s1413_s1 + $0xd8] sm:$0xff]   ;;  %v1055_v21 = vld [vmem:[%s1413_s1 + $0xd0] sm:$0xff]  }
   0x7   :  { %v1048_v14 = vld [vmem:[%s1413_s1 + $0x20] sm:$0xff]   ;;  %v1052_v18 = vld [vmem:[%s1413_s1 + $0x18] sm:$0xff]   ;;  %v1056_v22 = vld [vmem:[%s1413_s1 + $0x10] sm:$0xff]  }
   0x8   :  { %911 = vmatpush3.bf16.msra.mxu0 %v1040_v6  ;;  %v1049_v15 = vld [vmem:[%s1413_s1 + $0xa0] sm:$0xff]   ;;  %v1053_v19 = vld [vmem:[%s1413_s1 + $0x98] sm:$0xff]   ;;  %v1057_v23 = vld [vmem:[%s1413_s1 + $0x90] sm:$0xff]  }
   0x9   :  { %933 = vmatpush3.bf16.msra.mxu1 %v1041_v7  ;;  %912 = vmatprep.subr.bf16.mxu0 %v1042_v8  ;;  %v1058_v24 = vld [vmem:[%s1413_s1 + $0x48] sm:$0xff]   ;;  %v1062_v28 = vld [vmem:[%s1413_s1 + $0x40] sm:$0xff]   ;;  %v40_v33 = vld [vmem:[%s1414_s0 + $0x38] sm:$0xff] }
   0xa   :  { %934 = vmatprep.subr.bf16.mxu1 %v1043_v9  ;;  %v1059_v25 = vld [vmem:[%s1413_s1 + $0xc8] sm:$0xff]   ;;  %v1063_v29 = vld [vmem:[%s1413_s1 + $0xc0] sm:$0xff]   ;;  %v36_v34 = vld [vmem:[%s1414_s0 + $0x18] sm:$0xff] }
   0xb   :  { %v1060_v26 = vld [vmem:[%s1413_s1 + $0x8] sm:$0xff]   ;;  %v1064_v30 = vld [vmem:[%s1413_s1] sm:$0xff]   ;;  %v39_v38 = vld [vmem:[%s1414_s0 + $0x30] sm:$0xff] }
   0xc   :  { %913 = vmatpush3.bf16.msra.mxu0 %v1044_v10  ;;  %v1061_v27 = vld [vmem:[%s1413_s1 + $0x88] sm:$0xff]   ;;  %v1065_v31 = vld [vmem:[%s1413_s1 + $0x80] sm:$0xff]   ;;  %v35_v41 = vld [vmem:[%s1414_s0 + $0x10] sm:$0xff] }
   0xd   :  { %935 = vmatpush3.bf16.msra.mxu1 %v1045_v11  ;;  %914 = vmatprep.subr.bf16.mxu0 %v1046_v12  ;;  %v34_v32 = vld [vmem:[%s1414_s0 + $0x8] sm:$0xff]  ;;  %v33_v37 = vld [vmem:[%s1414_s0] sm:$0xff]  ;;  %v1066_v44 = vld [vmem:[%s1413_s1 + $0x178] sm:$0xff]  }
   0xe   :  { %936 = vmatprep.subr.bf16.mxu1 %v1047_v13  ;;  %v46_v35 = vpack.c.bf16 %v40_v33, %v34_v32  ;;  %v42_v36 = vld [vmem:[%s1414_s0 + $0x48] sm:$0xff]  ;;  %v45_v40 = vpack.c.bf16 %v39_v38, %v33_v37  ;;  %v41_v42 = vld [vmem:[%s1414_s0 + $0x40] sm:$0xff]  ;;  %v1067_v45 = vld [vmem:[%s1413_s1 + $0x138] sm:$0xff]  }
   0xf   :  { %v48_v39 = vpack.c.bf16 %v42_v36, %v36_v34  ;;  %v47_v43 = vpack.c.bf16 %v41_v42, %v35_v41  ;;  %v1068_v46 = vld [vmem:[%s1413_s1 + $0x170] sm:$0xff]   ;;  %v1070_v48 = vld [vmem:[%s1413_s1 + $0x168] sm:$0xff]   ;;  %v1072_v50 = vld [vmem:[%s1413_s1 + $0x160] sm:$0xff]  }
  0x10   :  { %915 = vmatpush3.bf16.msra.mxu0 %v1048_v14  ;;  %469 = vmatprep.mubr.bf16.mxu0 %v46_v35  ;;  %v1069_v47 = vld [vmem:[%s1413_s1 + $0x130] sm:$0xff]   ;;  %v1071_v49 = vld [vmem:[%s1413_s1 + $0x128] sm:$0xff]   ;;  %v1073_v51 = vld [vmem:[%s1413_s1 + $0x120] sm:$0xff]  }
  0x11   :  { %937 = vmatpush3.bf16.msra.mxu1 %v1049_v15  ;;  %916 = vmatprep.subr.bf16.mxu0 %v1050_v16  ;;  %v1074_v52 = vld [vmem:[%s1413_s1 + $0x158] sm:$0xff]   ;;  %v38_v54 = vld [vmem:[%s1414_s0 + $0x28] sm:$0xff]  ;;  %v1076_v55 = vld [vmem:[%s1413_s1 + $0x150] sm:$0xff]  }
  0x12   :  { %938 = vmatprep.subr.bf16.mxu1 %v1051_v17  ;;  %510 = vmatprep.mubr.bf16.mxu1 %v48_v39  ;;  %v1075_v53 = vld [vmem:[%s1413_s1 + $0x118] sm:$0xff]   ;;  %v1077_v58 = vld [vmem:[%s1413_s1 + $0x110] sm:$0xff]   ;;  %v1078_v59 = vld [vmem:[%s1413_s1 + $0x148] sm:$0xff]  }
  0x13   :  { %v44_v56 = vld [vmem:[%s1414_s0 + $0x58] sm:$0xff]  ;;  %v1079_v60 = vld [vmem:[%s1413_s1 + $0x108] sm:$0xff]   ;;  %v1080_v61 = vld [vmem:[%s1413_s1 + $0x140] sm:$0xff]  }
  0x14   :  { %917 = vmatpush3.bf16.msra.mxu0 %v1052_v18  ;;  %v50_v57 = vpack.c.bf16 %v44_v56, %v38_v54  ;;  %v1081_v62 = vld [vmem:[%s1413_s1 + $0x100] sm:$0xff]   ;;  %v43_v0 = vld [vmem:[%s1414_s0 + $0x50] sm:$0xff]  ;;  %v1082_v3 = vld [vmem:[%s1415_s3 + $0x38] sm:$0xff]  }
  0x15   :  { %939 = vmatpush3.bf16.msra.mxu1 %v1053_v19  ;;  %918 = vmatprep.subr.bf16.mxu0 %v1054_v20  ;;  %v37_v63 = vld [vmem:[%s1414_s0 + $0x20] sm:$0xff]  ;;  %v1083_v4 = vld [vmem:[%s1415_s3 + $0x30] sm:$0xff]   ;;  %v1084_v5 = vld [vmem:[%s1415_s3 + $0x28] sm:$0xff]  }
  0x16   :  { %940 = vmatprep.subr.bf16.mxu1 %v1055_v21  ;;  %v49_v1 = vpack.c.bf16 %v43_v0, %v37_v63  ;;  %v1085_v6 = vld [vmem:[%s1415_s3 + $0x20] sm:$0xff]   ;;  %v1086_v7 = vld [vmem:[%s1415_s3 + $0x18] sm:$0xff]   ;;  %v1087_v8 = vld [vmem:[%s1415_s3 + $0x10] sm:$0xff]  }
  0x17   :  { %v1088_v9 = vld [vmem:[%s1415_s3 + $0x8] sm:$0xff]   ;;  %v1089_v10 = vld [vmem:[%s1415_s3] sm:$0xff]   ;;  %v1090_v11 = vld [vmem:[%s1416_s5 + $0x38] sm:$0xff]  }
  0x18   :  { %919 = vmatpush3.bf16.msra.mxu0 %v1056_v22  ;;  %v1091_v12 = vld [vmem:[%s1416_s5 + $0x30] sm:$0xff]   ;;  %v1092_v13 = vld [vmem:[%s1416_s5 + $0x28] sm:$0xff]   ;;  %v1093_v14 = vld [vmem:[%s1416_s5 + $0x20] sm:$0xff]  }
  0x19   :  { %941 = vmatpush3.bf16.msra.mxu1 %v1057_v23  ;;  %920 = vmatprep.subr.bf16.mxu0 %v1058_v24  ;;  %v1094_v15 = vld [vmem:[%s1416_s5 + $0x18] sm:$0xff]   ;;  %v889_v34 = vld [vmem:[%s1417_s2] ss:$0 sm:$0xff] }
  0x1a   :  { %942 = vmatprep.subr.bf16.mxu1 %v1059_v25 }
  0x1c   :  { %921 = vmatpush3.bf16.msra.mxu0 %v1060_v26 }
  0x1d   :  { %943 = vmatpush3.bf16.msra.mxu1 %v1061_v27  ;;  %922 = vmatprep.subr.bf16.mxu0 %v1062_v28 }
  0x1e   :  { %944 = vmatprep.subr.bf16.mxu1 %v1063_v29 }
  0x20   :  { %923 = vmatpush3.bf16.msra.mxu0 %v1064_v30 }
  0x21   :  { %945 = vmatpush3.bf16.msra.mxu1 %v1065_v31  ;;  %952 = vmatprep.subr.bf16.mxu0 %v1066_v44  ;;  %v1095_v44 = vld [vmem:[%s1416_s5 + $0x10] sm:$0xff]  }
  0x22   :  { %992 = vmatprep.subr.bf16.mxu1 %v1106_v2 }
  0x23   :  { %470 = vmatmul.mubr.bf16.vlgmr.msra.gmra.mxu0 %v45_v40 }
  0x24   :  { %511 = vmatmul.mubr.bf16.vlgmr.msra.gmra.mxu1 %v47_v43  ;;  %953 = vmatpush3.bf16.msra.mxu0 %v1067_v45  ;;  %v1096_v45 = vld [vmem:[%s1416_s5 + $0x8] sm:$0xff]  }
  0x25   :  { %954 = vmatprep.subr.bf16.mxu0 %v1068_v46  ;;  %551 = vmatprep.mubr.bf16.mxu0 %v50_v57  ;;  %v1097_v46 = vld [vmem:[%s1416_s5] sm:$0xff]   ;;  %v808_v57 = vlaneseq }
  0x26   :  { %993 = vmatpush3.bf16.msra.mxu1 %v1082_v3  ;;  %1008 = vmatprep.mubr.msk.bf16.mxu1 %vm1107_vm0, %v1106_v2 }
  0x27   :  { %994 = vmatprep.subr.bf16.mxu1 %v1106_v2 }
  0x28   :  { %955 = vmatpush3.bf16.msra.mxu0 %v1069_v47  ;;  %v890_v47 = vld [vmem:[%s1418_s4] ss:$0 sm:$0xff] }
  0x29   :  { %956 = vmatprep.subr.bf16.mxu0 %v1070_v48 }
  0x2a   :  { %995 = vmatpush3.bf16.msra.mxu1 %v1083_v4 }
  0x2b   :  { %996 = vmatprep.subr.bf16.mxu1 %v1106_v2 }
  0x2c   :  { %957 = vmatpush3.bf16.msra.mxu0 %v1071_v49 }
  0x2d   :  { %958 = vmatprep.subr.bf16.mxu0 %v1072_v50 }
  0x2e   :  { %997 = vmatpush3.bf16.msra.mxu1 %v1084_v5 }
  0x2f   :  { %998 = vmatprep.subr.bf16.mxu1 %v1106_v2 }
  0x30   :  { %959 = vmatpush3.bf16.msra.mxu0 %v1073_v51 }
  0x31   :  { %960 = vmatprep.subr.bf16.mxu0 %v1074_v52 }
  0x32   :  { %999 = vmatpush3.bf16.msra.mxu1 %v1085_v6 }
  0x33   :  { %1000 = vmatprep.subr.bf16.mxu1 %v1106_v2 }
  0x34   :  { %961 = vmatpush3.bf16.msra.mxu0 %v1075_v53 }
  0x35   :  { %962 = vmatprep.subr.bf16.mxu0 %v1076_v55 }
  0x36   :  { %1001 = vmatpush3.bf16.msra.mxu1 %v1086_v7 }
  0x37   :  { %1002 = vmatprep.subr.bf16.mxu1 %v1106_v2 }
  0x38   :  { %963 = vmatpush3.bf16.msra.mxu0 %v1077_v58  ;;  %v809_v58 = vand.u32 127, %v808_v57 }
  0x39   :  { %964 = vmatprep.subr.bf16.mxu0 %v1078_v59  ;;  %v899_v59 = vld [vmem:[%s1419_s6] ss:$0 sm:$0xff] }
  0x3a   :  { %1003 = vmatpush3.bf16.msra.mxu1 %v1087_v8  ;;  %vm810_vm1 = vcmp.lt.s32.totalorder %v809_v58, 10 }
  0x3b   :  { %1004 = vmatprep.subr.bf16.mxu1 %v1106_v2 }
  0x3c   :  { %965 = vmatpush3.bf16.msra.mxu0 %v1079_v60 }
  0x3d   :  { %966 = vmatprep.subr.bf16.mxu0 %v1080_v61 }
  0x3e   :  { %1005 = vmatpush3.bf16.msra.mxu1 %v1088_v9 }
  0x3f   :  { %1006 = vmatprep.subr.bf16.mxu1 %v1106_v2 }
  0x40   :  { %967 = vmatpush3.bf16.msra.mxu0 %v1081_v62 }
  0x41   :  { %1012 = vmatprep.subr.bf16.mxu0 %v1106_v2 }
  0x42   :  { %1007 = vmatpush3.bf16.msra.mxu1 %v1089_v10 }
  0x43   :  { %552 = vmatmul.mubr.bf16.vlgmr.msra.gmra.mxu0 %v49_v1 }
  0x44   :  { %1028 = vmatprep.mubr.msk.bf16.mxu0 %vm1107_vm0, %v1106_v2  ;;  %1013 = vmatpush3.bf16.msra.mxu0 %v1090_v11 }
  0x45   :  { %1014 = vmatprep.subr.bf16.mxu0 %v1106_v2 }
  0x48   :  { %1015 = vmatpush3.bf16.msra.mxu0 %v1091_v12 }
  0x49   :  { %1016 = vmatprep.subr.bf16.mxu0 %v1106_v2 }
  0x4c   :  { %1017 = vmatpush3.bf16.msra.mxu0 %v1092_v13 }
  0x4d   :  { %1018 = vmatprep.subr.bf16.mxu0 %v1106_v2 }
  0x50   :  { %1019 = vmatpush3.bf16.msra.mxu0 %v1093_v14 }
  0x51   :  { %1020 = vmatprep.subr.bf16.mxu0 %v1106_v2 }
  0x54   :  { %1021 = vmatpush3.bf16.msra.mxu0 %v1094_v15 }
  0x55   :  { %1022 = vmatprep.subr.bf16.mxu0 %v1106_v2 }
  0x58   :  { %1023 = vmatpush3.bf16.msra.mxu0 %v1095_v44 }
  0x59   :  { %1024 = vmatprep.subr.bf16.mxu0 %v1106_v2 }
  0x5c   :  { %1025 = vmatpush3.bf16.msra.mxu0 %v1096_v45 }
  0x5d   :  { %1026 = vmatprep.subr.bf16.mxu0 %v1106_v2 }
  0x60   :  { %1027 = vmatpush3.bf16.msra.mxu0 %v1097_v46 }
  0xe3   :  { %v924_v16 = vpop.f32.mrf.mxu0 }
  0xe4   :  { %v946_v17 = vpop.f32.mrf.mxu1 }
  0xe5   :  { %v925_v18 = vpop.f32.mrf.mxu0 }
  0xe6   :  { %v947_v19 = vpop.f32.mrf.mxu1  ;;  %v926_v23 = vadd.f32 %v925_v18, %v924_v16 }
  0xe7   :  { %v927_v20 = vpop.f32.mrf.mxu0  ;;  %v948_v24 = vadd.f32 %v947_v19, %v946_v17 }
  0xe8   :  { %v949_v21 = vpop.f32.mrf.mxu1 }
  0xe9   :  { %v928_v22 = vpop.f32.mrf.mxu0  ;;  %v513_v28 = vadd.f32 %v948_v24, %v926_v23 }
  0xea   :  { %v950_v25 = vpop.f32.mrf.mxu1  ;;  %v929_v29 = vadd.f32 %v928_v22, %v927_v20 }
  0xeb   :  { %v951_v30 = vadd.f32 %v950_v25, %v949_v21 }
  0xed   :  { %v516_v36 = vadd.f32 %v951_v30, %v929_v29 }
 0x103   :  { %v968_v26 = vpop.f32.mrf.mxu0 }
 0x105   :  { %v969_v27 = vpop.f32.mrf.mxu0 }
 0x106   :  { %v970_v31 = vadd.f32 %v969_v27, %v968_v26 }
 0x107   :  { %v971_v32 = vpop.f32.mrf.mxu0 }
 0x108   :  { %v554_v33 = vadd.f32 %v970_v31, %v513_v28 }
 0x109   :  { %v972_v35 = vpop.f32.mrf.mxu0 }
 0x10a   :  { %v973_v37 = vadd.f32 %v972_v35, %v971_v32  ;;  %v576_v38 = vadd.f32 %v889_v34, %v554_v33 }
 0x10c   :  { %v557_v39 = vadd.f32 %v973_v37, %v516_v36  ;;  %v578_v41 = vmax.f32 %v576_v38, 0.0 }
 0x10e   :  { %v577_v40 = vadd.f32 %v889_v34, %v557_v39 }
 0x110   :  { %v579_v42 = vmax.f32 %v577_v40, 0.0 }
 0x112   :  { %v580_v43 = vpack.c.bf16 %v579_v42, %v578_v41 }
 0x114   :  { %1009 = vmatmul.mubr.bf16.vlgmr.msra.gmra.mxu1 %v580_v43 }
 0x1d4   :  { %v686_v48 = vpop.f32.mrf.mxu1 }
 0x1d5   :  { %v687_v50 = vadd.f32 %v890_v47, %v686_v48 }
 0x1d6   :  { %v1010_v49 = vpop.f32.mrf.mxu1 }
 0x1d7   :  { %v693_v54 = vmax.f32 %v687_v50, 0.0 }
 0x1d8   :  { %v689_v51 = vpop.f32.mrf.mxu1 }
 0x1d9   :  { %v690_v52 = vadd.f32 %v890_v47, %v689_v51 }
 0x1da   :  { %v1011_v53 = vpop.f32.mrf.mxu1 }
 0x1db   :  { %v694_v55 = vmax.f32 %v690_v52, 0.0 }
 0x1dd   :  { %v695_v56 = vpack.c.bf16 %v694_v55, %v693_v54 }
 0x1df   :  { %1029 = vmatmul.mubr.bf16.vlgmr.msra.gmra.mxu0 %v695_v56 }
 0x29f   :  { %v801_v60 = vpop.f32.mrf.mxu0 }
 0x2a0   :  { %v802_v61 = vadd.f32 %v899_v59, %v801_v60 }
 0x2a1   :  { %v1030_v62 = vpop.f32.mrf.mxu0 }
 0x2a2   :  { %v811_v63 = vsel %vm810_vm1, %v802_v61, -1e+30 }
 0x2a3   :  { %813 = vmax.xlane.f32.xlu0 %v811_v63  ;;  %v804_v0 = vpop.f32.mrf.mxu0 }
 0x2a4   :  { %v805_v1 = vadd.f32 %v899_v59, %v804_v0 }
 0x2a5   :  { %v1031_v2 = vpop.f32.mrf.mxu0 }
 0x2a6   :  { %v812_v3 = vsel %vm810_vm1, %v805_v1, -1e+30 }
 0x2a7   :  { %815 = vmax.xlane.f32.xlu0 %v812_v3 }
 0x32c   :  { %v814_v4 = vpop.xlane.xlu0 %813 }
 0x32d   :  { %v817_v5 = vsub.f32 %v811_v63, %v814_v4 }
 0x32f   :  { %v819_v6 = vmul.f32 1.442695, %v817_v5 }
 0x330   :  { %v816_v7 = vpop.xlane.xlu0 %815 }
 0x331   :  { %1098 = vpow2.f32 %v819_v6  ;;  %v818_v8 = vsub.f32 %v812_v3, %v816_v7 }
 0x333   :  { %v821_v9 = vmul.f32 1.442695, %v818_v8 }
 0x335   :  { %1100 = vpow2.f32 %v821_v9 }
 0x33e   :  { %v1099_v10 = vpop.eup %1098 }
 0x33f   :  { %v823_v11 = vsel %vm810_vm1, %v1099_v10, 0.0 }
 0x340   :  { %825 = vadd.xlane.f32.xlu1 %v823_v11 }
 0x342   :  { %v1101_v12 = vpop.eup %1100 }
 0x343   :  { %v824_v13 = vsel %vm810_vm1, %v1101_v12, 0.0 }
 0x344   :  { %827 = vadd.xlane.f32.xlu1 %v824_v13 }
 0x3c9   :  { %v826_v14 = vpop.xlane.xlu1 %825 }
 0x3ca   :  { %1102 = vlog2.f32 %v826_v14 }
 0x3cd   :  { %v828_v15 = vpop.xlane.xlu1 %827 }
 0x3ce   :  { %1104 = vlog2.f32 %v828_v15 }
 0x3d7   :  { %v1103_v16 = vpop.eup %1102 }
 0x3d8   :  { %v830_v17 = vmul.f32 0.6931472, %v1103_v16 }
 0x3da   :  { %v833_v18 = vsub.f32 %v817_v5, %v830_v17 }
 0x3db   :  { %v1105_v19 = vpop.eup %1104 }
 0x3dc   :  { %835 = vst [vmem:[%s1420_s7] sm:$0xff] %v833_v18  ;;  %v832_v20 = vmul.f32 0.6931472, %v1105_v19 }
 0x3de   :  { %v834_v21 = vsub.f32 %v818_v8, %v832_v20 }
 0x3e0   :  { %836 = vst [vmem:[%s1420_s7 + $0x8] sm:$0xff] %v834_v21 }

</bundles_post_ra>
